<compile_context>
chip_gen: v7x
topology: tpu7x:2x2x1
jax: 0.10.0
libtpu: 0.0.40
codegen_flags: <defaults>
</compile_context>

<pallas_src>
import functools

import jax
import jax.numpy as jnp
from jax import lax
from jax.experimental import pallas as pl
from jax.experimental.pallas import tpu as pltpu


def _round_up(x, m):
    return (x + m - 1) // m * m


def _vmem_limit_bytes():
    # ~75% of physical VMEM: ~96 MiB on v5e/v6e (128 MiB parts), ~48 MiB on v7x (64 MiB).
    try:
        cap = getattr(pltpu.get_tpu_info(), "vmem_capacity_bytes", None)
        if cap:
            return int(cap) * 3 // 4
    except Exception:
        pass
    return 64 * 1024 * 1024


# ---------------------------------------------------------------------------
# Kernel 1: fused QKV projection (head-major outputs) + FSMN depthwise conv.
# grid = (time tiles,)  [parallel]
# ---------------------------------------------------------------------------
def _proj_fsmn_kernel(x_ref, xp_ref, xn_ref, wqkv_ref, bqkv_ref, wfsmn_ref,
                      q_ref, k_ref, v_ref, fsmn_ref,
                      *, h, d_k, n_feat, t, t_pad, bt, lp, ksize):
    i = pl.program_id(0)

    x = x_ref[...]                         # (bt, in_feat)  (bf16)
    w = wqkv_ref[...]                      # (in_feat, 3n)  (bf16, resident)
    qkv = jnp.dot(x, w, preferred_element_type=jnp.float32) + bqkv_ref[...]

    q = qkv[:, :n_feat]
    k = qkv[:, n_feat:2 * n_feat]
    v = qkv[:, 2 * n_feat:]

    # Head-major layout for kernel 2 (leading-dim head indexing there is free).
    for hh in range(h):
        sl = slice(hh * d_k, (hh + 1) * d_k)
        q_ref[hh, :, :] = q[:, sl].astype(q_ref.dtype)
        k_ref[hh, :, :] = k[:, sl].astype(k_ref.dtype)
        v_ref[hh, :, :] = v[:, sl].astype(v_ref.dtype)

    # ---- FSMN branch: depthwise conv over time + residual, with explicit halo ----
    if t != t_pad:  # zero v rows beyond the true sequence length (right zero-padding)
        row = i * bt + lax.broadcasted_iota(jnp.int32, (bt, 1), 0)
        v_c = jnp.where(row < t, v, 0.0)
    else:
        v_c = v

    if lp > 0:
        # Re-project only the `lp` halo rows from the neighbouring x tiles (cheap),
        # and mask rows that fall outside [0, t) (the conv's zero padding).
        wv = w[:, 2 * n_feat:]
        bv = bqkv_ref[:, 2 * n_feat:]
        xp = xp_ref[bt - lp:, :]
        xn = xn_ref[:lp, :]
        v_p = jnp.dot(xp, wv, preferred_element_type=jnp.float32) + bv
        v_n = jnp.dot(xn, wv, preferred_element_type=jnp.float32) + bv
        rp = i * bt - lp + lax.broadcasted_iota(jnp.int32, (lp, 1), 0)
        rn = (i + 1) * bt + lax.broadcasted_iota(jnp.int32, (lp, 1), 0)
        v_p = jnp.where(rp >= 0, v_p, 0.0)
        v_n = jnp.where(rn < t, v_n, 0.0)
        v_halo = jnp.concatenate([v_p, v_c, v_n], axis=0)   # (bt + 2*lp, n_feat)
    else:
        v_halo = v_c

    wf = wfsmn_ref[...]                    # (ksize, n_feat), tap-major
    acc = v_c                              # residual "+ inputs"
    for j in range(ksize):                 # static, unrolled tap loop (VPU)
        acc = acc + v_halo[j:j + bt, :] * wf[j:j + 1, :]
    fsmn_ref[...] = acc


# ---------------------------------------------------------------------------
# Kernel 2: attention (in-kernel head loop, resident k/v/Wo) + single K=n_feat
# output projection + FSMN/bias fold-in.   grid = (time tiles,)  [parallel]
# ---------------------------------------------------------------------------
def _attn_out_kernel(q_ref, k_ref, v_ref, wo_ref, fsmn_ref, bo_ref, out_ref,
                     *, h, t, t_pad, mxu_dtype):
    if t != t_pad:
        kmask = lax.broadcasted_iota(jnp.int32, (1, t_pad), 1) < t

    ctx_parts = []
    for hh in range(h):                    # static head loop (leading-dim index = free)
        qh = q_ref[hh]                     # (bt, d_k)
        kh = k_ref[hh]                     # (t_pad, d_k)   resident
        vh = v_ref[hh]                     # (t_pad, d_k)   resident

        # scores = q @ k.T without materialising a transpose of k.
        s = lax.dot_general(qh, kh, dimension_numbers=(((1,), (1,)), ((), ())),
                            preferred_element_type=jnp.float32)       # (bt, t_pad)
        if t != t_pad:
            s = jnp.where(kmask, s, -1e30)                            # mask padded keys

        # Max-stabilised softmax with deferred normalisation (after p @ v).
        m = jnp.max(s, axis=-1, keepdims=True)
        p = jnp.exp(s - m)
        l = jnp.sum(p, axis=-1, keepdims=True)
        ctx = jnp.dot(p.astype(mxu_dtype), vh, preferred_element_type=jnp.float32)
        ctx_parts.append(ctx * pl.reciprocal(l, approx=True))

    # Merge heads (head-major feature concat) -> single K=n_feat output projection.
    ctx_all = jnp.concatenate(ctx_parts, axis=-1)                     # (bt, n_feat)
    out = jnp.dot(ctx_all.astype(mxu_dtype), wo_ref[...],
                  preferred_element_type=jnp.float32)
    out_ref[...] = out + bo_ref[...] + fsmn_ref[...]


# ---------------------------------------------------------------------------
# Wrapper
# ---------------------------------------------------------------------------
def sanm_attention_forward(x, params, *, kernel_size, sanm_shift=0,
                           time_block=256, mxu_dtype=jnp.bfloat16):
    """x: (1, t, in_feat) -> (1, t, n_feat). Mirrors MultiHeadedAttentionSANM.forward."""
    assert x.ndim == 3 and x.shape[0] == 1, "export variant is batch-1"
    x2d = x[0].astype(jnp.float32)
    t, in_feat = x2d.shape
    h, _, d_k = params["wq_h"].shape
    n_feat = h * d_k
    mxu_dtype = jnp.dtype(mxu_dtype)

    lp = (kernel_size - 1) // 2 + sanm_shift
    # The torch module pads `lp` zeros on BOTH sides; shapes are only consistent
    # when kernel_size == 2*lp + 1 (odd kernel, sanm_shfit == 0).
    assert kernel_size == 2 * lp + 1, "unsupported (kernel_size, sanm_shfit) combo"

    # Time tiling: pad t up to a multiple of the tile; the tail is masked in-kernel.
    granule = 16                                   # bf16-safe sublane granule
    bt = min(int(time_block), _round_up(t, granule))
    bt = max(_round_up(bt, granule), granule)
    t_pad = _round_up(t, bt)
    nb = t_pad // bt
    assert lp <= bt, "FSMN halo larger than the time tile"  # TODO(synk): multi-tile halo

    if t_pad != t:
        x2d = jnp.pad(x2d, ((0, t_pad - t), (0, 0)))

    # Fused lane-dense projection weights (head-major q/k columns == torch layout).
    wq = params["wq_h"].transpose(1, 0, 2).reshape(in_feat, n_feat)
    wk = params["wk_h"].transpose(1, 0, 2).reshape(in_feat, n_feat)
    wqkv = jnp.concatenate([wq, wk, params["wv"]], axis=1).astype(mxu_dtype)
    bqkv = jnp.concatenate([params["bq_h"].reshape(n_feat),
                            params["bk_h"].reshape(n_feat),
                            params["bv"].reshape(n_feat)]).reshape(1, 3 * n_feat)
    bqkv = bqkv.astype(jnp.float32)
    wfsmn = params["fsmn_w"].T.astype(jnp.float32)                 # (kernel_size, n_feat)
    wo = params["wo_h"].reshape(n_feat, n_feat).astype(mxu_dtype)  # undecomposed Wo
    bo = params["bo"].reshape(1, n_feat).astype(jnp.float32)
    x_in = x2d.astype(mxu_dtype)

    vmem_limit = _vmem_limit_bytes()

    # ---- kernel 1: fused QKV projection (head-major) + FSMN, tiled over time ----
    q_hm, k_hm, v_hm, fsmn = pl.pallas_call(
        functools.partial(_proj_fsmn_kernel, h=h, d_k=d_k, n_feat=n_feat,
                          t=t, t_pad=t_pad, bt=bt, lp=lp, ksize=kernel_size),
        out_shape=(jax.ShapeDtypeStruct((h, t_pad, d_k), mxu_dtype),
                   jax.ShapeDtypeStruct((h, t_pad, d_k), mxu_dtype),
                   jax.ShapeDtypeStruct((h, t_pad, d_k), mxu_dtype),
                   jax.ShapeDtypeStruct((t_pad, n_feat), jnp.float32)),
        grid_spec=pltpu.PrefetchScalarGridSpec(
            num_scalar_prefetch=0,
            grid=(nb,),
            in_specs=[
                pl.BlockSpec((bt, in_feat), lambda i: (i, 0)),                      # x tile
                pl.BlockSpec((bt, in_feat), lambda i: (jnp.maximum(i - 1, 0), 0)),  # prev (halo)
                pl.BlockSpec((bt, in_feat),
                             lambda i: (jnp.minimum(i + 1, nb - 1), 0)),            # next (halo)
                pl.BlockSpec((in_feat, 3 * n_feat), lambda i: (0, 0)),              # [Wq|Wk|Wv]
                pl.BlockSpec((1, 3 * n_feat), lambda i: (0, 0)),                    # fused bias
                pl.BlockSpec((kernel_size, n_feat), lambda i: (0, 0)),              # fsmn taps
            ],
            out_specs=(pl.BlockSpec((h, bt, d_k), lambda i: (0, i, 0)),
                       pl.BlockSpec((h, bt, d_k), lambda i: (0, i, 0)),
                       pl.BlockSpec((h, bt, d_k), lambda i: (0, i, 0)),
                       pl.BlockSpec((bt, n_feat), lambda i: (i, 0))),
        ),
        compiler_params=pltpu.CompilerParams(
            dimension_semantics=("parallel",),
            vmem_limit_bytes=vmem_limit),
    )(x_in, x_in, x_in, wqkv, bqkv, wfsmn)

    # ---- kernel 2: attention + merged output projection + FSMN/bias fold-in ----
    out_pad = pl.pallas_call(
        functools.partial(_attn_out_kernel, h=h, t=t, t_pad=t_pad,
                          mxu_dtype=mxu_dtype),
        out_shape=jax.ShapeDtypeStruct((t_pad, n_feat), jnp.float32),
        grid_spec=pltpu.PrefetchScalarGridSpec(
            num_scalar_prefetch=0,
            grid=(nb,),
            in_specs=[
                pl.BlockSpec((h, bt, d_k), lambda i: (0, i, 0)),      # q tile
                pl.BlockSpec((h, t_pad, d_k), lambda i: (0, 0, 0)),   # k (resident, all heads)
                pl.BlockSpec((h, t_pad, d_k), lambda i: (0, 0, 0)),   # v (resident, all heads)
                pl.BlockSpec((n_feat, n_feat), lambda i: (0, 0)),     # Wo (full, resident)
                pl.BlockSpec((bt, n_feat), lambda i: (i, 0)),         # fsmn branch tile
                pl.BlockSpec((1, n_feat), lambda i: (0, 0)),          # bo
            ],
            out_specs=pl.BlockSpec((bt, n_feat), lambda i: (i, 0)),
        ),
        compiler_params=pltpu.CompilerParams(
            dimension_semantics=("parallel",),
            vmem_limit_bytes=vmem_limit),
    )(q_hm, k_hm, v_hm, wo, fsmn, bo)

    out = out_pad[:t] if t_pad != t else out_pad
    return out[None, :, :]                                            # (1, t, n_feat)


# ---------------------------------------------------------------------------
# Pure-JAX transcription of the PyTorch forward (for validation).
# ---------------------------------------------------------------------------
def reference_forward(x, params, *, kernel_size, sanm_shift=0):
    h, _, d_k = params["wq_h"].shape
    n_feat = h * d_k
    t = x.shape[1]
    left_pad = (kernel_size - 1) // 2 + sanm_shift

    q_h = jnp.matmul(x, params["wq_h"]) + params["bq_h"]                      # (h, t, d_k)
    k_h = jnp.swapaxes(jnp.matmul(x, params["wk_h"]) + params["bk_h"], 1, 2)  # (h, d_k, t)
    v = jnp.matmul(x, params["wv"]) + params["bv"]                            # (1, t, n)
    v_h = jnp.swapaxes(v.reshape(t, h, d_k), 0, 1)                            # (h, t, d_k)

    scores = jnp.matmul(q_h, k_h)                                             # (h, t, t)
    attn = jnp.matmul(jax.nn.softmax(scores, axis=-1), v_h)                   # (h, t, d_k)
    att_out = jnp.matmul(attn, params["wo_h"]).sum(0, keepdims=True) + params["bo"]

    vt = jnp.swapaxes(v, 1, 2)                                                # (1, n, t)
    zpad = jnp.zeros((1, n_feat, left_pad), jnp.float32)
    cat = jnp.concatenate([zpad, vt, zpad], axis=-1)
    conv = jax.lax.conv_general_dilated(
        cat, params["fsmn_w"][:, None, :], window_strides=(1,),
        padding="VALID", feature_group_count=n_feat)                          # (1, n, t)
    fsmn = jnp.swapaxes(conv, 1, 2) + v
    return att_out + fsmn                                                     # (1, t, n)


def make_params(key, n_head, in_feat, n_feat, kernel_size):
    d_k = n_feat // n_head
    ks = jax.random.split(key, 9)
    s_in = 1.0 / jnp.sqrt(jnp.float32(in_feat))
    s_nf = 1.0 / jnp.sqrt(jnp.float32(n_feat))
    wq = jax.random.normal(ks[0], (in_feat, n_feat), jnp.float32) * s_in
    bq = jax.random.normal(ks[1], (n_feat,), jnp.float32) * 0.1
    wk = jax.random.normal(ks[2], (in_feat, n_feat), jnp.float32) * s_in
    bk = jax.random.normal(ks[3], (n_feat,), jnp.float32) * 0.1
    wv = jax.random.normal(ks[4], (in_feat, n_feat), jnp.float32) * s_in
    bv = jax.random.normal(ks[5], (n_feat,), jnp.float32) * 0.1
    wo = jax.random.normal(ks[6], (n_feat, n_feat), jnp.float32) * s_nf
    bo = jax.random.normal(ks[7], (n_feat,), jnp.float32) * 0.1
    fsmn_w = jax.random.normal(ks[8], (n_feat, kernel_size), jnp.float32) * 0.1
    return {
        # Per-head decomposed q/k weights, exactly as the exported torch module holds them.
        "wq_h": wq.reshape(in_feat, n_head, d_k).transpose(1, 0, 2),     # (h, in_feat, d_k)
        "bq_h": bq.reshape(n_head, 1, d_k),
        "wk_h": wk.reshape(in_feat, n_head, d_k).transpose(1, 0, 2),
        "bk_h": bk.reshape(n_head, 1, d_k),
        "wv": wv,                                                        # (in_feat, n_feat)
        "bv": bv,                                                        # (n_feat,)
        "wo_h": wo.reshape(n_head, d_k, n_feat),                         # (h, d_k, n_feat)
        "bo": bo.reshape(1, n_feat),
        "fsmn_w": fsmn_w,                                                # Conv1d weight[:, 0, :]
    }


if __name__ == "__main__":
    key = jax.random.PRNGKey(0)

    def run_case(t, n_head, in_feat, n_feat, kernel_size, time_block):
        kx, kp = jax.random.split(jax.random.fold_in(key, t))
        x = jax.random.normal(kx, (1, t, in_feat), jnp.float32)
        params = make_params(kp, n_head, in_feat, n_feat, kernel_size)
        out = jax.block_until_ready(
            sanm_attention_forward(x, params, kernel_size=kernel_size,
                                   time_block=time_block))
        ref = jax.block_until_ready(
            reference_forward(x, params, kernel_size=kernel_size))
        assert out.shape == (1, t, n_feat), out.shape
        err = float(jnp.max(jnp.abs(out - ref)))
        # bf16 MXU inputs + approx reciprocal => loosened (relative) tolerance.
        tol = 2e-3 + 2.5e-2 * float(jnp.max(jnp.abs(ref)))
        assert err < tol, (err, tol)

    # Aligned single-tile case, and a ragged multi-tile case that exercises the
    # FSMN halo and tail-masking paths.
    run_case(t=16, n_head=4, in_feat=64, n_feat=32, kernel_size=5, time_block=256)
    run_case(t=40, n_head=4, in_feat=64, n_feat=32, kernel_size=5, time_block=16)
    print("KERNEL_OK")
</pallas_src>

<mosaic_0001>
module attributes {stable_mosaic.version = 11 : i64} {
  func.func @_proj_fsmn_kernel(%arg0: i32, %arg1: memref<16x64xbf16, #tpu.memory_space<vmem>>, %arg2: memref<16x64xbf16, #tpu.memory_space<vmem>>, %arg3: memref<16x64xbf16, #tpu.memory_space<vmem>>, %arg4: memref<64x96xbf16, #tpu.memory_space<vmem>>, %arg5: memref<1x96xf32, #tpu.memory_space<vmem>>, %arg6: memref<5x32xf32, #tpu.memory_space<vmem>>, %arg7: memref<4x16x8xbf16, #tpu.memory_space<vmem>>, %arg8: memref<4x16x8xbf16, #tpu.memory_space<vmem>>, %arg9: memref<4x16x8xbf16, #tpu.memory_space<vmem>>, %arg10: memref<16x32xf32, #tpu.memory_space<vmem>>) attributes {dimension_semantics = [#tpu.dimension_semantics<parallel>], iteration_bounds = array<i64: 1>, scalar_prefetch = 0 : i64, scratch_operands = 0 : i64, tpu.core_type = #tpu.core_type<tc>, window_params = [{transform_indices = @transform_0, window_bounds = array<i64: 16, 64>}, {transform_indices = @transform_1, window_bounds = array<i64: 16, 64>}, {transform_indices = @transform_2, window_bounds = array<i64: 16, 64>}, {pipeline_mode = #tpu.pipeline_mode<synchronous>, transform_indices = @transform_3, window_bounds = array<i64: 64, 96>}, {pipeline_mode = #tpu.pipeline_mode<synchronous>, transform_indices = @transform_4, window_bounds = array<i64: 1, 96>}, {pipeline_mode = #tpu.pipeline_mode<synchronous>, transform_indices = @transform_5, window_bounds = array<i64: 5, 32>}, {transform_indices = @transform_6, window_bounds = array<i64: 4, 16, 8>}, {transform_indices = @transform_7, window_bounds = array<i64: 4, 16, 8>}, {transform_indices = @transform_8, window_bounds = array<i64: 4, 16, 8>}, {transform_indices = @transform_9, window_bounds = array<i64: 16, 32>}]} {
    %c0 = arith.constant 0 : index
    %c0_0 = arith.constant 0 : index
    %0 = vector.load %arg1[%c0, %c0_0] : memref<16x64xbf16, #tpu.memory_space<vmem>>, vector<16x64xbf16>
    %c0_1 = arith.constant 0 : index
    %c0_2 = arith.constant 0 : index
    %1 = vector.load %arg4[%c0_1, %c0_2] : memref<64x96xbf16, #tpu.memory_space<vmem>>, vector<64x96xbf16>
    %cst = arith.constant dense<0.000000e+00> : vector<16x96xf32>
    %2 = tpu.matmul %0, %1, %cst {dimension_numbers = #tpu.dot_dimension_numbers<[1], [0], [0], [1], [0, 0, 1, 1], [], []>} : vector<16x64xbf16>, vector<64x96xbf16>, vector<16x96xf32> -> vector<16x96xf32>
    %c0_3 = arith.constant 0 : index
    %c0_4 = arith.constant 0 : index
    %3 = vector.load %arg5[%c0_3, %c0_4] : memref<1x96xf32, #tpu.memory_space<vmem>>, vector<1x96xf32>
    %4 = vector.broadcast %3 : vector<1x96xf32> to vector<16x96xf32>
    %5 = arith.addf %2, %4 : vector<16x96xf32>
    %6 = vector.extract_strided_slice %5 {offsets = [0, 0], sizes = [16, 32], strides = [1, 1]} : vector<16x96xf32> to vector<16x32xf32>
    %7 = vector.extract_strided_slice %5 {offsets = [0, 32], sizes = [16, 32], strides = [1, 1]} : vector<16x96xf32> to vector<16x32xf32>
    %8 = vector.extract_strided_slice %5 {offsets = [0, 64], sizes = [16, 32], strides = [1, 1]} : vector<16x96xf32> to vector<16x32xf32>
    %9 = vector.extract_strided_slice %6 {offsets = [0, 0], sizes = [16, 8], strides = [1, 1]} : vector<16x32xf32> to vector<16x8xf32>
    %10 = arith.truncf %9 : vector<16x8xf32> to vector<16x8xbf16>
    %c0_5 = arith.constant 0 : index
    %c0_6 = arith.constant 0 : index
    %c0_7 = arith.constant 0 : index
    %11 = vector.load %arg7[%c0_5, %c0_6, %c0_7] : memref<4x16x8xbf16, #tpu.memory_space<vmem>>, vector<1x16x8xbf16>
    %12 = vector.shape_cast %11 : vector<1x16x8xbf16> to vector<16x8xbf16>
    %13 = vector.shape_cast %10 : vector<16x8xbf16> to vector<1x16x8xbf16>
    tpu.vector_store %arg7[%c0_5, %c0_6, %c0_7], %13 {strides = array<i32>} : memref<4x16x8xbf16, #tpu.memory_space<vmem>>, vector<1x16x8xbf16>,
    %14 = vector.extract_strided_slice %7 {offsets = [0, 0], sizes = [16, 8], strides = [1, 1]} : vector<16x32xf32> to vector<16x8xf32>
    %15 = arith.truncf %14 : vector<16x8xf32> to vector<16x8xbf16>
    %c0_8 = arith.constant 0 : index
    %c0_9 = arith.constant 0 : index
    %c0_10 = arith.constant 0 : index
    %16 = vector.load %arg8[%c0_8, %c0_9, %c0_10] : memref<4x16x8xbf16, #tpu.memory_space<vmem>>, vector<1x16x8xbf16>
    %17 = vector.shape_cast %16 : vector<1x16x8xbf16> to vector<16x8xbf16>
    %18 = vector.shape_cast %15 : vector<16x8xbf16> to vector<1x16x8xbf16>
    tpu.vector_store %arg8[%c0_8, %c0_9, %c0_10], %18 {strides = array<i32>} : memref<4x16x8xbf16, #tpu.memory_space<vmem>>, vector<1x16x8xbf16>,
    %19 = vector.extract_strided_slice %8 {offsets = [0, 0], sizes = [16, 8], strides = [1, 1]} : vector<16x32xf32> to vector<16x8xf32>
    %20 = arith.truncf %19 : vector<16x8xf32> to vector<16x8xbf16>
    %c0_11 = arith.constant 0 : index
    %c0_12 = arith.constant 0 : index
    %c0_13 = arith.constant 0 : index
    %21 = vector.load %arg9[%c0_11, %c0_12, %c0_13] : memref<4x16x8xbf16, #tpu.memory_space<vmem>>, vector<1x16x8xbf16>
    %22 = vector.shape_cast %21 : vector<1x16x8xbf16> to vector<16x8xbf16>
    %23 = vector.shape_cast %20 : vector<16x8xbf16> to vector<1x16x8xbf16>
    tpu.vector_store %arg9[%c0_11, %c0_12, %c0_13], %23 {strides = array<i32>} : memref<4x16x8xbf16, #tpu.memory_space<vmem>>, vector<1x16x8xbf16>,
    %24 = vector.extract_strided_slice %6 {offsets = [0, 8], sizes = [16, 8], strides = [1, 1]} : vector<16x32xf32> to vector<16x8xf32>
    %25 = arith.truncf %24 : vector<16x8xf32> to vector<16x8xbf16>
    %c1 = arith.constant 1 : index
    %c0_14 = arith.constant 0 : index
    %c0_15 = arith.constant 0 : index
    %26 = vector.load %arg7[%c1, %c0_14, %c0_15] : memref<4x16x8xbf16, #tpu.memory_space<vmem>>, vector<1x16x8xbf16>
    %27 = vector.shape_cast %26 : vector<1x16x8xbf16> to vector<16x8xbf16>
    %28 = vector.shape_cast %25 : vector<16x8xbf16> to vector<1x16x8xbf16>
    tpu.vector_store %arg7[%c1, %c0_14, %c0_15], %28 {strides = array<i32>} : memref<4x16x8xbf16, #tpu.memory_space<vmem>>, vector<1x16x8xbf16>,
    %29 = vector.extract_strided_slice %7 {offsets = [0, 8], sizes = [16, 8], strides = [1, 1]} : vector<16x32xf32> to vector<16x8xf32>
    %30 = arith.truncf %29 : vector<16x8xf32> to vector<16x8xbf16>
    %c1_16 = arith.constant 1 : index
    %c0_17 = arith.constant 0 : index
    %c0_18 = arith.constant 0 : index
    %31 = vector.load %arg8[%c1_16, %c0_17, %c0_18] : memref<4x16x8xbf16, #tpu.memory_space<vmem>>, vector<1x16x8xbf16>
    %32 = vector.shape_cast %31 : vector<1x16x8xbf16> to vector<16x8xbf16>
    %33 = vector.shape_cast %30 : vector<16x8xbf16> to vector<1x16x8xbf16>
    tpu.vector_store %arg8[%c1_16, %c0_17, %c0_18], %33 {strides = array<i32>} : memref<4x16x8xbf16, #tpu.memory_space<vmem>>, vector<1x16x8xbf16>,
    %34 = vector.extract_strided_slice %8 {offsets = [0, 8], sizes = [16, 8], strides = [1, 1]} : vector<16x32xf32> to vector<16x8xf32>
    %35 = arith.truncf %34 : vector<16x8xf32> to vector<16x8xbf16>
    %c1_19 = arith.constant 1 : index
    %c0_20 = arith.constant 0 : index
    %c0_21 = arith.constant 0 : index
    %36 = vector.load %arg9[%c1_19, %c0_20, %c0_21] : memref<4x16x8xbf16, #tpu.memory_space<vmem>>, vector<1x16x8xbf16>
    %37 = vector.shape_cast %36 : vector<1x16x8xbf16> to vector<16x8xbf16>
    %38 = vector.shape_cast %35 : vector<16x8xbf16> to vector<1x16x8xbf16>
    tpu.vector_store %arg9[%c1_19, %c0_20, %c0_21], %38 {strides = array<i32>} : memref<4x16x8xbf16, #tpu.memory_space<vmem>>, vector<1x16x8xbf16>,
    %39 = vector.extract_strided_slice %6 {offsets = [0, 16], sizes = [16, 8], strides = [1, 1]} : vector<16x32xf32> to vector<16x8xf32>
    %40 = arith.truncf %39 : vector<16x8xf32> to vector<16x8xbf16>
    %c2 = arith.constant 2 : index
    %c0_22 = arith.constant 0 : index
    %c0_23 = arith.constant 0 : index
    %41 = vector.load %arg7[%c2, %c0_22, %c0_23] : memref<4x16x8xbf16, #tpu.memory_space<vmem>>, vector<1x16x8xbf16>
    %42 = vector.shape_cast %41 : vector<1x16x8xbf16> to vector<16x8xbf16>
    %43 = vector.shape_cast %40 : vector<16x8xbf16> to vector<1x16x8xbf16>
    tpu.vector_store %arg7[%c2, %c0_22, %c0_23], %43 {strides = array<i32>} : memref<4x16x8xbf16, #tpu.memory_space<vmem>>, vector<1x16x8xbf16>,
    %44 = vector.extract_strided_slice %7 {offsets = [0, 16], sizes = [16, 8], strides = [1, 1]} : vector<16x32xf32> to vector<16x8xf32>
    %45 = arith.truncf %44 : vector<16x8xf32> to vector<16x8xbf16>
    %c2_24 = arith.constant 2 : index
    %c0_25 = arith.constant 0 : index
    %c0_26 = arith.constant 0 : index
    %46 = vector.load %arg8[%c2_24, %c0_25, %c0_26] : memref<4x16x8xbf16, #tpu.memory_space<vmem>>, vector<1x16x8xbf16>
    %47 = vector.shape_cast %46 : vector<1x16x8xbf16> to vector<16x8xbf16>
    %48 = vector.shape_cast %45 : vector<16x8xbf16> to vector<1x16x8xbf16>
    tpu.vector_store %arg8[%c2_24, %c0_25, %c0_26], %48 {strides = array<i32>} : memref<4x16x8xbf16, #tpu.memory_space<vmem>>, vector<1x16x8xbf16>,
    %49 = vector.extract_strided_slice %8 {offsets = [0, 16], sizes = [16, 8], strides = [1, 1]} : vector<16x32xf32> to vector<16x8xf32>
    %50 = arith.truncf %49 : vector<16x8xf32> to vector<16x8xbf16>
    %c2_27 = arith.constant 2 : index
    %c0_28 = arith.constant 0 : index
    %c0_29 = arith.constant 0 : index
    %51 = vector.load %arg9[%c2_27, %c0_28, %c0_29] : memref<4x16x8xbf16, #tpu.memory_space<vmem>>, vector<1x16x8xbf16>
    %52 = vector.shape_cast %51 : vector<1x16x8xbf16> to vector<16x8xbf16>
    %53 = vector.shape_cast %50 : vector<16x8xbf16> to vector<1x16x8xbf16>
    tpu.vector_store %arg9[%c2_27, %c0_28, %c0_29], %53 {strides = array<i32>} : memref<4x16x8xbf16, #tpu.memory_space<vmem>>, vector<1x16x8xbf16>,
    %54 = vector.extract_strided_slice %6 {offsets = [0, 24], sizes = [16, 8], strides = [1, 1]} : vector<16x32xf32> to vector<16x8xf32>
    %55 = arith.truncf %54 : vector<16x8xf32> to vector<16x8xbf16>
    %c3 = arith.constant 3 : index
    %c0_30 = arith.constant 0 : index
    %c0_31 = arith.constant 0 : index
    %56 = vector.load %arg7[%c3, %c0_30, %c0_31] : memref<4x16x8xbf16, #tpu.memory_space<vmem>>, vector<1x16x8xbf16>
    %57 = vector.shape_cast %56 : vector<1x16x8xbf16> to vector<16x8xbf16>
    %58 = vector.shape_cast %55 : vector<16x8xbf16> to vector<1x16x8xbf16>
    tpu.vector_store %arg7[%c3, %c0_30, %c0_31], %58 {strides = array<i32>} : memref<4x16x8xbf16, #tpu.memory_space<vmem>>, vector<1x16x8xbf16>,
    %59 = vector.extract_strided_slice %7 {offsets = [0, 24], sizes = [16, 8], strides = [1, 1]} : vector<16x32xf32> to vector<16x8xf32>
    %60 = arith.truncf %59 : vector<16x8xf32> to vector<16x8xbf16>
    %c3_32 = arith.constant 3 : index
    %c0_33 = arith.constant 0 : index
    %c0_34 = arith.constant 0 : index
    %61 = vector.load %arg8[%c3_32, %c0_33, %c0_34] : memref<4x16x8xbf16, #tpu.memory_space<vmem>>, vector<1x16x8xbf16>
    %62 = vector.shape_cast %61 : vector<1x16x8xbf16> to vector<16x8xbf16>
    %63 = vector.shape_cast %60 : vector<16x8xbf16> to vector<1x16x8xbf16>
    tpu.vector_store %arg8[%c3_32, %c0_33, %c0_34], %63 {strides = array<i32>} : memref<4x16x8xbf16, #tpu.memory_space<vmem>>, vector<1x16x8xbf16>,
    %64 = vector.extract_strided_slice %8 {offsets = [0, 24], sizes = [16, 8], strides = [1, 1]} : vector<16x32xf32> to vector<16x8xf32>
    %65 = arith.truncf %64 : vector<16x8xf32> to vector<16x8xbf16>
    %c3_35 = arith.constant 3 : index
    %c0_36 = arith.constant 0 : index
    %c0_37 = arith.constant 0 : index
    %66 = vector.load %arg9[%c3_35, %c0_36, %c0_37] : memref<4x16x8xbf16, #tpu.memory_space<vmem>>, vector<1x16x8xbf16>
    %67 = vector.shape_cast %66 : vector<1x16x8xbf16> to vector<16x8xbf16>
    %68 = vector.shape_cast %65 : vector<16x8xbf16> to vector<1x16x8xbf16>
    tpu.vector_store %arg9[%c3_35, %c0_36, %c0_37], %68 {strides = array<i32>} : memref<4x16x8xbf16, #tpu.memory_space<vmem>>, vector<1x16x8xbf16>,
    %69 = vector.extract_strided_slice %1 {offsets = [0, 64], sizes = [64, 32], strides = [1, 1]} : vector<64x96xbf16> to vector<64x32xbf16>
    %c0_38 = arith.constant 0 : index
    %c64 = arith.constant 64 : index
    %70 = vector.load %arg5[%c0_38, %c64] : memref<1x96xf32, #tpu.memory_space<vmem>>, vector<1x32xf32>
    %c14 = arith.constant 14 : index
    %c0_39 = arith.constant 0 : index
    %71 = vector.load %arg2[%c14, %c0_39] : memref<16x64xbf16, #tpu.memory_space<vmem>>, vector<2x64xbf16>
    %c0_40 = arith.constant 0 : index
    %c0_41 = arith.constant 0 : index
    %72 = vector.load %arg3[%c0_40, %c0_41] : memref<16x64xbf16, #tpu.memory_space<vmem>>, vector<2x64xbf16>
    %cst_42 = arith.constant dense<0.000000e+00> : vector<2x32xf32>
    %73 = tpu.matmul %71, %69, %cst_42 {dimension_numbers = #tpu.dot_dimension_numbers<[1], [0], [0], [1], [0, 0, 1, 1], [], []>} : vector<2x64xbf16>, vector<64x32xbf16>, vector<2x32xf32> -> vector<2x32xf32>
    %74 = vector.broadcast %70 : vector<1x32xf32> to vector<2x32xf32>
    %75 = arith.addf %73, %74 : vector<2x32xf32>
    %cst_43 = arith.constant dense<0.000000e+00> : vector<2x32xf32>
    %76 = tpu.matmul %72, %69, %cst_43 {dimension_numbers = #tpu.dot_dimension_numbers<[1], [0], [0], [1], [0, 0, 1, 1], [], []>} : vector<2x64xbf16>, vector<64x32xbf16>, vector<2x32xf32> -> vector<2x32xf32>
    %77 = vector.broadcast %70 : vector<1x32xf32> to vector<2x32xf32>
    %78 = arith.addf %76, %77 : vector<2x32xf32>
    %c16_i32 = arith.constant 16 : i32
    %79 = arith.muli %arg0, %c16_i32 : i32
    %c2_i32 = arith.constant 2 : i32
    %80 = arith.subi %79, %c2_i32 : i32
    %81 = tpu.iota {dimensions = array<i32: 0>} : vector<2x1xi32>
    %82 = vector.broadcast %80 : i32 to vector<2x1xi32>
    %83 = arith.addi %82, %81 : vector<2x1xi32>
    %c1_i32 = arith.constant 1 : i32
    %84 = arith.addi %arg0, %c1_i32 : i32
    %c16_i32_44 = arith.constant 16 : i32
    %85 = arith.muli %84, %c16_i32_44 : i32
    %86 = tpu.iota {dimensions = array<i32: 0>} : vector<2x1xi32>
    %87 = vector.broadcast %85 : i32 to vector<2x1xi32>
    %88 = arith.addi %87, %86 : vector<2x1xi32>
    %c0_i32 = arith.constant 0 : i32
    %89 = vector.broadcast %c0_i32 : i32 to vector<2x1xi32>
    %90 = arith.cmpi sge, %83, %89 : vector<2x1xi32>
    %cst_45 = arith.constant 0.000000e+00 : f32
    %91 = vector.shape_cast %90 : vector<2x1xi1> to vector<2x1xi1>
    %92 = vector.broadcast %91 : vector<2x1xi1> to vector<2x32xi1>
    %93 = vector.broadcast %cst_45 : f32 to vector<2x32xf32>
    %94 = arith.select %92, %75, %93 : vector<2x32xi1>, vector<2x32xf32>
    %c16_i32_46 = arith.constant 16 : i32
    %95 = vector.broadcast %c16_i32_46 : i32 to vector<2x1xi32>
    %96 = arith.cmpi slt, %88, %95 : vector<2x1xi32>
    %cst_47 = arith.constant 0.000000e+00 : f32
    %97 = vector.shape_cast %96 : vector<2x1xi1> to vector<2x1xi1>
    %98 = vector.broadcast %97 : vector<2x1xi1> to vector<2x32xi1>
    %99 = vector.broadcast %cst_47 : f32 to vector<2x32xf32>
    %100 = arith.select %98, %78, %99 : vector<2x32xi1>, vector<2x32xf32>
    %101 = tpu.concatenate %94, %8, %100 in 0 : vector<2x32xf32>, vector<16x32xf32>, vector<2x32xf32> -> vector<20x32xf32>
    %c0_48 = arith.constant 0 : index
    %c0_49 = arith.constant 0 : index
    %102 = vector.load %arg6[%c0_48, %c0_49] : memref<5x32xf32, #tpu.memory_space<vmem>>, vector<5x32xf32>
    %103 = vector.extract_strided_slice %101 {offsets = [0, 0], sizes = [16, 32], strides = [1, 1]} : vector<20x32xf32> to vector<16x32xf32>
    %104 = vector.extract_strided_slice %102 {offsets = [0, 0], sizes = [1, 32], strides = [1, 1]} : vector<5x32xf32> to vector<1x32xf32>
    %105 = vector.broadcast %104 : vector<1x32xf32> to vector<16x32xf32>
    %106 = arith.mulf %103, %105 : vector<16x32xf32>
    %107 = arith.addf %8, %106 : vector<16x32xf32>
    %108 = vector.extract_strided_slice %101 {offsets = [1, 0], sizes = [16, 32], strides = [1, 1]} : vector<20x32xf32> to vector<16x32xf32>
    %109 = vector.extract_strided_slice %102 {offsets = [1, 0], sizes = [1, 32], strides = [1, 1]} : vector<5x32xf32> to vector<1x32xf32>
    %110 = vector.broadcast %109 : vector<1x32xf32> to vector<16x32xf32>
    %111 = arith.mulf %108, %110 : vector<16x32xf32>
    %112 = arith.addf %107, %111 : vector<16x32xf32>
    %113 = vector.extract_strided_slice %101 {offsets = [2, 0], sizes = [16, 32], strides = [1, 1]} : vector<20x32xf32> to vector<16x32xf32>
    %114 = vector.extract_strided_slice %102 {offsets = [2, 0], sizes = [1, 32], strides = [1, 1]} : vector<5x32xf32> to vector<1x32xf32>
    %115 = vector.broadcast %114 : vector<1x32xf32> to vector<16x32xf32>
    %116 = arith.mulf %113, %115 : vector<16x32xf32>
    %117 = arith.addf %112, %116 : vector<16x32xf32>
    %118 = vector.extract_strided_slice %101 {offsets = [3, 0], sizes = [16, 32], strides = [1, 1]} : vector<20x32xf32> to vector<16x32xf32>
    %119 = vector.extract_strided_slice %102 {offsets = [3, 0], sizes = [1, 32], strides = [1, 1]} : vector<5x32xf32> to vector<1x32xf32>
    %120 = vector.broadcast %119 : vector<1x32xf32> to vector<16x32xf32>
    %121 = arith.mulf %118, %120 : vector<16x32xf32>
    %122 = arith.addf %117, %121 : vector<16x32xf32>
    %123 = vector.extract_strided_slice %101 {offsets = [4, 0], sizes = [16, 32], strides = [1, 1]} : vector<20x32xf32> to vector<16x32xf32>
    %124 = vector.extract_strided_slice %102 {offsets = [4, 0], sizes = [1, 32], strides = [1, 1]} : vector<5x32xf32> to vector<1x32xf32>
    %125 = vector.broadcast %124 : vector<1x32xf32> to vector<16x32xf32>
    %126 = arith.mulf %123, %125 : vector<16x32xf32>
    %127 = arith.addf %122, %126 : vector<16x32xf32>
    %c0_50 = arith.constant 0 : index
    %c0_51 = arith.constant 0 : index
    %128 = vector.load %arg10[%c0_50, %c0_51] : memref<16x32xf32, #tpu.memory_space<vmem>>, vector<16x32xf32>
    tpu.vector_store %arg10[%c0_50, %c0_51], %127 {strides = array<i32>} : memref<16x32xf32, #tpu.memory_space<vmem>>, vector<16x32xf32>,
    return
  }
  func.func @transform_0(%arg0: i32) -> (i32, i32) {
    %c0_i32 = arith.constant 0 : i32
    %c0_i32_0 = arith.constant 0 : i32
    return %arg0, %c0_i32 : i32, i32
  }
  func.func @transform_1(%arg0: i32) -> (i32, i32) {
    %c1_i32 = arith.constant 1 : i32
    %0 = arith.subi %arg0, %c1_i32 : i32
    %c0_i32 = arith.constant 0 : i32
    %1 = arith.maxsi %0, %c0_i32 : i32
    %c0_i32_0 = arith.constant 0 : i32
    %c0_i32_1 = arith.constant 0 : i32
    return %1, %c0_i32_0 : i32, i32
  }
  func.func @transform_2(%arg0: i32) -> (i32, i32) {
    %c1_i32 = arith.constant 1 : i32
    %0 = arith.addi %arg0, %c1_i32 : i32
    %c0_i32 = arith.constant 0 : i32
    %1 = arith.minsi %0, %c0_i32 : i32
    %c0_i32_0 = arith.constant 0 : i32
    %c0_i32_1 = arith.constant 0 : i32
    return %1, %c0_i32_0 : i32, i32
  }
  func.func @transform_3(%arg0: i32) -> (i32, i32) {
    %c0_i32 = arith.constant 0 : i32
    %c0_i32_0 = arith.constant 0 : i32
    %c0_i32_1 = arith.constant 0 : i32
    return %c0_i32, %c0_i32_0 : i32, i32
  }
  func.func @transform_4(%arg0: i32) -> (i32, i32) {
    %c0_i32 = arith.constant 0 : i32
    %c0_i32_0 = arith.constant 0 : i32
    %c0_i32_1 = arith.constant 0 : i32
    return %c0_i32, %c0_i32_0 : i32, i32
  }
  func.func @transform_5(%arg0: i32) -> (i32, i32) {
    %c0_i32 = arith.constant 0 : i32
    %c0_i32_0 = arith.constant 0 : i32
    %c0_i32_1 = arith.constant 0 : i32
    return %c0_i32, %c0_i32_0 : i32, i32
  }
  func.func @transform_6(%arg0: i32) -> (i32, i32, i32) {
    %c0_i32 = arith.constant 0 : i32
    %c0_i32_0 = arith.constant 0 : i32
    %c0_i32_1 = arith.constant 0 : i32
    return %c0_i32, %arg0, %c0_i32_0 : i32, i32, i32
  }
  func.func @transform_7(%arg0: i32) -> (i32, i32, i32) {
    %c0_i32 = arith.constant 0 : i32
    %c0_i32_0 = arith.constant 0 : i32
    %c0_i32_1 = arith.constant 0 : i32
    return %c0_i32, %arg0, %c0_i32_0 : i32, i32, i32
  }
  func.func @transform_8(%arg0: i32) -> (i32, i32, i32) {
    %c0_i32 = arith.constant 0 : i32
    %c0_i32_0 = arith.constant 0 : i32
    %c0_i32_1 = arith.constant 0 : i32
    return %c0_i32, %arg0, %c0_i32_0 : i32, i32, i32
  }
  func.func @transform_9(%arg0: i32) -> (i32, i32) {
    %c0_i32 = arith.constant 0 : i32
    %c0_i32_0 = arith.constant 0 : i32
    return %arg0, %c0_i32 : i32, i32
  }
}

</mosaic_0001>

<bundles_post_ra>
// kernel: tpu_custom_call.1
= control target key start
LH: loop header
LB: loop body
LE: loop exit
PB: predicated region body
PF: predicated region fallthrough
CT: control target
= control target key end

     0   :  { %15 = vsyncpa [#allocation3], 0  ;;  %s1348_s0 = inlined_call_operand.hbm [shape: bf16[16,64], index: 0, kind: input, shape index: {}]   ;;  %s1349_s1 = inlined_call_operand.hbm [shape: bf16[16,64], index: 1, kind: input, shape index: {}]   ;;  %s1350_s2 = inlined_call_operand.hbm [shape: bf16[16,64], index: 2, kind: input, shape index: {}]   ;;  %s1351_s3 = inlined_call_operand.hbm [shape: bf16[64,96], index: 3, kind: input, shape index: {}]   ;;  %s1352_s4 = inlined_call_operand.hbm [shape: f32[1,96], index: 4, kind: input, shape index: {}]   ;;  %s1353_s5 = inlined_call_operand.hbm [shape: f32[5,32], index: 5, kind: input, shape index: {}]   ;;  %s1354_s6 = inlined_call_operand.hbm [shape: bf16[4,16,8], index: 6, kind: output, shape index: {0}]   ;;  %s1355_s7 = inlined_call_operand.hbm [shape: bf16[4,16,8], index: 7, kind: output, shape index: {1}]   ;;  %s1356_s8 = inlined_call_operand.hbm [shape: bf16[4,16,8], index: 8, kind: output, shape index: {2}]   ;;  %s1357_s9 = inlined_call_operand.hbm [shape: f32[16,32], index: 9, kind: output, shape index: {3}]  }
   0x1   :  { %16 = vsyncpa [#allocation6], 0 }
   0x2   :  { %17 = vsyncpa [#allocation9], 0 }
   0x3   :  { %18 = vsyncpa [#allocation12], 0 }
   0x4   :  { %19 = vsyncpa [#allocation4], 0 }
   0x5   :  { %20 = vsyncpa [#allocation15], 0 }
   0x6   :  { %21 = vsyncpa [#allocation18], 0  ;;  %s1006_s30 = smov [#allocation5]   ;;  %s1007_s11 = smov [#allocation8]  }
   0x7   :  { %s45_s10 = sshll.u32 %s1006_s30, 4  ;;  %s75_s12 = sshll.u32 %s1007_s11, 4  ;;  %s46_s10 = int_to_ptr.vmem [resolvable:$true] %s45_s10  ;;  %s1082_s12 = int_to_ptr.vmem [resolvable:$true] %s75_s12 }
   0x8   :  { %s772_s15 = scalar_lea.hbm %s1349_s1, 128 }
   0x9   :  { %p773_p0 = scmp.ne.s32.totalorder %s1349_s1, %s772_s15  ;;  %p776_p1 = scmp.lt.u32.totalorder %s772_s15, %s1349_s1 }
   0xb   :  { %p778_p2 = pnand %p776_p1, %p773_p0 }
   0xd   :  { %781 = shalt.err (!%p778_p2)
}
   0xe   :  { %s782_s20 = scalar_lea.vmem %s46_s10, 128  ;;  %p787_p4 = scmp.lt.s32.totalorder %s46_s10, %s46_s10 }
   0xf   :  { %p783_p3 = scmp.ne.s32.totalorder %s46_s10, %s782_s20  ;;  %p788_p5 = scmp.lt.s32.totalorder %s782_s20, %s782_s20 }
  0x11   :  { %p789_p6 = por %p788_p5, %p787_p4 }
  0x13   :  { %p790_p7 = pnand %p789_p6, %p783_p3 }
  0x15   :  { %793 = shalt.err (!%p790_p7)
}
  0x16   :  { %s1008_s21 = smov 64   ;;  %s1009_s22 = smov 4  }
  0x17   :  { %51 = dma.hbm_to_vmem [thread:$0]  %s1349_s1, 128, %s46_s10, [#allocation6], %s1008_s21, %s1008_s21, %s1009_s22  }
  0x18   :  { %s794_s27 = scalar_lea.hbm %s1351_s3, 512 }
  0x19   :  { %p795_p8 = scmp.ne.s32.totalorder %s1351_s3, %s794_s27  ;;  %p798_p9 = scmp.lt.u32.totalorder %s794_s27, %s1351_s3 }
  0x1b   :  { %p800_p10 = pnand %p798_p9, %p795_p8 }
  0x1d   :  { %803 = shalt.err (!%p800_p10)
}
  0x1e   :  { %s804_s13 = scalar_lea.vmem %s1082_s12, 512  ;;  %p809_p12 = scmp.lt.s32.totalorder %s1082_s12, %s1082_s12 }
  0x1f   :  { %p805_p11 = scmp.ne.s32.totalorder %s1082_s12, %s804_s13  ;;  %p810_p13 = scmp.lt.s32.totalorder %s804_s13, %s804_s13 }
  0x21   :  { %p811_p0 = por %p810_p13, %p809_p12 }
  0x23   :  { %p812_p1 = pnand %p811_p0, %p805_p11 }
  0x25   :  { %815 = shalt.err (!%p812_p1)
}
  0x26   :  { %81 = dma.hbm_to_vmem [thread:$0]  %s1351_s3, 512, %s1082_s12, [#allocation9], %s1008_s21, %s1008_s21, %s1009_s22  }
  0x27   :  { %s1010_s14 = smov [#allocation2]   ;;  %s1011_s16 = smov [#allocation7]  }
  0x28   :  { %s27_s15 = sshll.u32 %s1010_s14, 4  ;;  %s63_s17 = sshll.u32 %s1011_s16, 4  ;;  %s28_s15 = int_to_ptr.vmem [resolvable:$true] %s27_s15  ;;  %s1119_s17 = int_to_ptr.vmem [resolvable:$true] %s63_s17 }
  0x29   :  { %s816_s20 = scalar_lea.hbm %s1348_s0, 128 }
  0x2a   :  { %p817_p2 = scmp.ne.s32.totalorder %s1348_s0, %s816_s20  ;;  %p820_p3 = scmp.lt.u32.totalorder %s816_s20, %s1348_s0 }
  0x2c   :  { %p822_p4 = pnand %p820_p3, %p817_p2 }
  0x2e   :  { %825 = shalt.err (!%p822_p4)
}
  0x2f   :  { %s826_s3 = scalar_lea.vmem %s28_s15, 128  ;;  %p831_p6 = scmp.lt.s32.totalorder %s28_s15, %s28_s15 }
  0x30   :  { %p827_p5 = scmp.ne.s32.totalorder %s28_s15, %s826_s3  ;;  %p832_p7 = scmp.lt.s32.totalorder %s826_s3, %s826_s3 }
  0x32   :  { %p833_p8 = por %p832_p7, %p831_p6 }
  0x34   :  { %p834_p9 = pnand %p833_p8, %p827_p5 }
  0x36   :  { %837 = shalt.err (!%p834_p9)
}
  0x37   :  { %33 = dma.hbm_to_vmem [thread:$0]  %s1348_s0, 128, %s28_s15, [#allocation3], %s1008_s21, %s1008_s21, %s1009_s22  }
  0x38   :  { %s838_s30 = scalar_lea.hbm %s1350_s2, 128 }
  0x39   :  { %p839_p10 = scmp.ne.s32.totalorder %s1350_s2, %s838_s30  ;;  %p842_p11 = scmp.lt.u32.totalorder %s838_s30, %s1350_s2 }
  0x3b   :  { %p844_p12 = pnand %p842_p11, %p839_p10 }
  0x3d   :  { %847 = shalt.err (!%p844_p12)
}
  0x3e   :  { %s848_s14 = scalar_lea.vmem %s1119_s17, 128  ;;  %p853_p0 = scmp.lt.s32.totalorder %s1119_s17, %s1119_s17 }
  0x3f   :  { %p849_p13 = scmp.ne.s32.totalorder %s1119_s17, %s848_s14  ;;  %p854_p1 = scmp.lt.s32.totalorder %s848_s14, %s848_s14 }
  0x41   :  { %p855_p2 = por %p854_p1, %p853_p0 }
  0x43   :  { %p856_p3 = pnand %p855_p2, %p849_p13 }
  0x45   :  { %859 = shalt.err (!%p856_p3)
}
  0x46   :  { %69 = dma.hbm_to_vmem [thread:$0]  %s1350_s2, 128, %s1119_s17, [#allocation6], %s1008_s21, %s1008_s21, %s1009_s22  }
  0x47   :  { %s1012_s16 = smov [#allocation10]   ;;  %s1013_s19 = smov [#allocation11]  }
  0x48   :  { %s88_s18 = sshll.u32 %s1012_s16, 4  ;;  %s98_s20 = sshll.u32 %s1013_s19, 4  ;;  %s89_s18 = int_to_ptr.vmem [resolvable:$true] %s88_s18  ;;  %s99_s20 = int_to_ptr.vmem [resolvable:$true] %s98_s20 }
  0x49   :  { %s860_s25 = scalar_lea.hbm %s1352_s4, 16 }
  0x4a   :  { %p861_p4 = scmp.ne.s32.totalorder %s1352_s4, %s860_s25  ;;  %p864_p5 = scmp.lt.u32.totalorder %s860_s25, %s1352_s4 }
  0x4c   :  { %p866_p6 = pnand %p864_p5, %p861_p4 }
  0x4e   :  { %869 = shalt.err (!%p866_p6)
}
  0x4f   :  { %s870_s2 = scalar_lea.vmem %s89_s18, 16  ;;  %s874_s17 = scalar_lea.vmem %s89_s18, 32 }
  0x50   :  { %p871_p7 = scmp.ne.s32.totalorder %s89_s18, %s870_s2  ;;  %p875_p8 = scmp.lt.s32.totalorder %s89_s18, %s89_s18 }
  0x51   :  { %p876_p9 = scmp.lt.s32.totalorder %s874_s17, %s870_s2 }
  0x53   :  { %p877_p10 = por %p876_p9, %p875_p8 }
  0x55   :  { %p878_p11 = pnand %p877_p10, %p871_p7 }
  0x57   :  { %881 = shalt.err (!%p878_p11)
}
  0x58   :  { %91 = dma.hbm_to_vmem [thread:$0]  %s1352_s4, 16, %s89_s18, [#allocation9]  }
  0x59   :  { %s882_s13 = scalar_lea.hbm %s1353_s5, 128 }
  0x5a   :  { %p883_p12 = scmp.ne.s32.totalorder %s1353_s5, %s882_s13  ;;  %p886_p13 = scmp.lt.u32.totalorder %s882_s13, %s1353_s5 }
  0x5c   :  { %p888_p0 = pnand %p886_p13, %p883_p12 }
  0x5e   :  { %891 = shalt.err (!%p888_p0)
}
  0x5f   :  { %s892_s15 = scalar_lea.vmem %s99_s20, 128  ;;  %p897_p2 = scmp.lt.s32.totalorder %s99_s20, %s99_s20 }
  0x60   :  { %p893_p1 = scmp.ne.s32.totalorder %s99_s20, %s892_s15  ;;  %p898_p3 = scmp.lt.s32.totalorder %s892_s15, %s892_s15 }
  0x62   :  { %p899_p4 = por %p898_p3, %p897_p2 }
  0x64   :  { %p900_p5 = pnand %p899_p4, %p893_p1 }
  0x66   :  { %903 = shalt.err (!%p900_p5)
}
  0x67   :  { %101 = dma.hbm_to_vmem [thread:$0]  %s1353_s5, 128, %s99_s20, [#allocation12]  }
  0x68   :  { %992 = dma.done.wait [#allocation3], 128  }
  0x69   :  { %993 = vsyncadd [#allocation3], 4294967168 }
  0x6a   :  { %994 = dma.done.wait [#allocation6], 256  }
  0x6b   :  { %995 = vsyncadd [#allocation6], 4294967040 }
  0x6c   :  { %996 = dma.done.wait [#allocation9], 528  }
  0x6d   :  { %997 = vsyncadd [#allocation9], 4294966768 }
  0x6e   :  { %998 = dma.done.wait [#allocation12], 128  }
  0x6f   :  { %999 = vsyncadd [#allocation12], 4294967168  ;;  %v1014_v0 = vmov 0.0   ;;  %vm1015_vm0 = vmmov 0   ;;  %v766_v1 = vld [vmem:[#allocation8] sm:$0xff]   ;;  %v767_v2 = vld [vmem:[#allocation8 + $0x8] sm:$0xff]   ;;  %v443_v25 = vlaneseq }
  0x70   :  { %704 = vmatprep.subr.bf16.mxu0 %v1014_v0  ;;  %712 = vmatprep.mubr.msk.bf16.mxu0 %vm1015_vm0, %v1014_v0  ;;  %v768_v3 = vld [vmem:[#allocation8 + $0x10] sm:$0xff]   ;;  %v769_v4 = vld [vmem:[#allocation8 + $0x18] sm:$0xff]   ;;  %v674_v5 = vld [vmem:[#allocation10] ss:$0 sm:$0xff]  ;;  %vm175_vm1 = vcmask 523264   ;;  %vm228_vm2 = vcmask 60416  }
  0x71   :  { %716 = vmatprep.subr.bf16.mxu1 %v1014_v0  ;;  %724 = vmatprep.mubr.msk.bf16.mxu1 %vm1015_vm0, %v1014_v0  ;;  %v770_v6 = vld [vmem:[#allocation2] sm:$0xff]   ;;  %v771_v10 = vld [vmem:[#allocation5 + $0x4] ss:$0 sps:$4 sm:$0x88]   ;;  %vm461_vm3 = vcmask 1041408   ;;  %v444_v26 = vshrl.u32 %v443_v25, 7 }
  0x72   :  { %705 = vmatpush3.bf16.msra.mxu0 %v766_v1  ;;  %340 = vrot.lane.b32.xlu0 %v766_v1, %s1008_s21  ;;  %v339_v12 = vrot.slane %v771_v10, 3  ;;  %v330_v24 = vld [vmem:[#allocation7] sm:$0x1]  ;;  %v479_v30 = vld [vmem:[#allocation11] sm:$0x1f]  ;;  %v475_v39 = vrot.slane %v1014_v0, 6 }
  0x73   :  { %706 = vmatprep.subr.bf16.mxu0 %v1014_v0  ;;  %344 = vrot.lane.b32.xlu1 %v768_v3, %s1008_s21  ;;  %v446_v27 = vadd.s32 4294967294, %v444_v26  ;;  %v482_v29 = vsub.s32 0, %v444_v26  ;;  %v498_v31 = vsub.s32 1, %v444_v26  ;;  %v522_v41 = vsub.s32 2, %v444_v26  ;;  %s1016_s5 = smov 96   ;;  %s1017_s18 = smov 88  }
  0x74   :  { %v546_v46 = vsub.s32 3, %v444_v26  ;;  %vm506_vm5 = vcmask 1046528   ;;  %v570_v61 = vsub.s32 4, %v444_v26  ;;  %vm530_vm6 = vcmask 1045504   ;;  %s1018_s19 = smov 80   ;;  %s1019_s20 = smov 72  }
  0x75   :  { %vm451_vm4 = vcmp.ge.s32.totalorder %v446_v27, 0  ;;  %v483_v36 = vrot.slane %v479_v30, %v482_v29  ;;  %v499_v40 = vrot.slane %v479_v30, %v498_v31  ;;  %v523_v49 = vrot.slane %v479_v30, %v522_v41  ;;  %s1020_s23 = smov 120   ;;  %s1021_s24 = smov 56  }
  0x76   :  { %707 = vmatpush3.bf16.msra.mxu0 %v767_v2  ;;  %342 = vrot.lane.b32.xlu0 %v767_v2, %s1008_s21  ;;  %v547_v57 = vrot.slane %v479_v30, %v546_v46  ;;  %vm554_vm7 = vcmask 1044480   ;;  %vm578_vm8 = vcmask 1043456   ;;  %s1022_s25 = smov 112   ;;  %s1023_s26 = smov 48  }
  0x77   :  { %708 = vmatprep.subr.bf16.mxu0 %v1014_v0  ;;  %346 = vrot.lane.b32.xlu1 %v769_v4, %s1008_s21  ;;  %s1024_s3 = smov 104   ;;  %s1025_s12 = smov 40  }
  0x78   :  { %s1026_s27 = smov [#allocation14]  }
  0x79   :  { %s620_s2 = sshll.u32 %s1026_s27, 4  ;;  %s621_s2 = int_to_ptr.vmem [resolvable:$true] %s620_s2 }
  0x7a   :  { %709 = vmatpush3.bf16.msra.mxu0 %v768_v3  ;;  %352 = vrot.lane.b32.xlu0 %v674_v5, %s1008_s21  ;;  %s904_s17 = scalar_lea.vmem %s621_s2, 512  ;;  %p909_p7 = scmp.lt.s32.totalorder %s621_s2, %s621_s2 }
  0x7b   :  { %710 = vmatprep.subr.bf16.mxu0 %v1014_v0  ;;  %p905_p6 = scmp.ne.s32.totalorder %s621_s2, %s904_s17  ;;  %p910_p8 = scmp.lt.s32.totalorder %s904_s17, %s904_s17 }
  0x7d   :  { %p911_p9 = por %p910_p8, %p909_p7 }
  0x7e   :  { %711 = vmatpush3.bf16.msra.mxu0 %v769_v4 }
  0x7f   :  { %728 = vmatprep.subr.bf16.mxu0 %v1014_v0  ;;  %p912_p10 = pnand %p911_p9, %p905_p6 }
  0x81   :  { %713 = vmatmul.mubr.msk.bf16.vlgmr.msra.gmra.mrb[0].mxu0 %vm175_vm1, %v770_v6  ;;  %v571_v6 = vrot.slane %v479_v30, %v570_v61 }
  0x82   :  { %736 = vmatprep.mubr.msk.bf16.mxu0 %vm1015_vm0, %v1014_v0 }
  0xe4   :  { %v341_v7 = vpop.permute.xlu0 %340 }
  0xe5   :  { %717 = vmatpush3.bf16.msra.mxu1 %v341_v7  ;;  %729 = vmatpush3.bf16.msra.mxu0 %v341_v7  ;;  %v345_v9 = vpop.permute.xlu1 %344 }
  0xe6   :  { %718 = vmatprep.subr.bf16.mxu1 %v1014_v0  ;;  %730 = vmatprep.subr.bf16.mxu0 %v1014_v0 }
  0xe8   :  { %v343_v8 = vpop.permute.xlu0 %342 }
  0xe9   :  { %719 = vmatpush3.bf16.msra.mxu1 %v343_v8  ;;  %731 = vmatpush3.bf16.msra.mxu0 %v343_v8  ;;  %v347_v11 = vpop.permute.xlu1 %346 }
  0xea   :  { %720 = vmatprep.subr.bf16.mxu1 %v1014_v0  ;;  %732 = vmatprep.subr.bf16.mxu0 %v1014_v0 }
  0xec   :  { %v353_v28 = vpop.permute.xlu0 %352 }
  0xed   :  { %721 = vmatpush3.bf16.msra.mxu1 %v345_v9  ;;  %733 = vmatpush3.bf16.msra.mxu0 %v345_v9 }
  0xee   :  { %722 = vmatprep.subr.bf16.mxu1 %v1014_v0  ;;  %734 = vmatprep.subr.bf16.mxu0 %v1014_v0 }
  0xf1   :  { %723 = vmatpush3.bf16.msra.mxu1 %v347_v11  ;;  %735 = vmatpush3.bf16.msra.mxu0 %v347_v11 }
  0xf4   :  { %725 = vmatmul.mubr.msk.bf16.vlgmr.msra.gmra.mrb[0].mxu1 %vm175_vm1, %v339_v12  ;;  %737 = vmatmul.mubr.msk.bf16.vlgmr.msra.gmra.mrb[4].mxu0 %vm175_vm1, %v330_v24 }
 0x154   :  { %v213_v13 = vpop.f32.mrb[0].mxu0 }
 0x155   :  { %v1205_v14 = vadd.f32 %v674_v5, %v213_v13  ;;  %v714_v15 = vpop.f32.mrb[1].mxu0 }
 0x156   :  { %v216_v16 = vpop.f32.mrb[2].mxu0 }
 0x157   :  { %v1209_v17 = vpack.c.bf16 %v1205_v14, %v1205_v14  ;;  %v1211_v18 = vadd.f32 %v674_v5, %v216_v16  ;;  %v715_v19 = vpop.f32.mrb[3].mxu0  ;;  %v462_v20 = vrot.slane %v1205_v14, 6 }
 0x159   :  { %v1216_v21 = vpack.c.bf16 %v1211_v18, %v1211_v18  ;;  %465 = vrot.lane.b32.xlu1 %v462_v20, %s1008_s21  ;;  %v463_v22 = vrot.slane %v1211_v18, 6  ;;  %229 = vst.msk [vmem:[#allocation13] sm:$0xf] %vm228_vm2, %v1209_v17 }
 0x15b   :  { %469 = vrot.lane.b32.xlu0 %v463_v22, %s1008_s21  ;;  %v464_v23 = vsel %vm461_vm3, %v462_v20, %v463_v22  ;;  %230 = vst.msk [vmem:[#allocation13 + $0x4] sm:$0xf] %vm228_vm2, %v1216_v21 }
 0x15d   :  { %467 = vrot.lane.b32.xlu1 %v464_v23, %s1008_s21 }
 0x1c7   :  { %v392_v32 = vpop.f32.mrb[0].mxu1 }
 0x1c8   :  { %v393_v33 = vadd.f32 %v392_v32, %v353_v28  ;;  %v726_v34 = vpop.f32.mrb[1].mxu1  ;;  %v435_v28 = vpop.f32.mrb[4].mxu0 }
 0x1c9   :  { %v395_v35 = vpop.f32.mrb[2].mxu1  ;;  %v738_v29 = vpop.f32.mrb[5].mxu0 }
 0x1ca   :  { %v454_v37 = vsel %vm451_vm4, %v393_v33, 0.0  ;;  %v727_v38 = vpop.f32.mrb[3].mxu1  ;;  %v438_v31 = vpop.f32.mrb[6].mxu0 }
 0x1cb   :  { %v466_v42 = vpop.permute.xlu1 %465  ;;  %v739_v33 = vpop.f32.mrb[7].mxu0 }
 0x1cc   :  { %v477_v43 = vsel %vm461_vm3, %v454_v37, %v466_v42 }
 0x1cd   :  { %v470_v44 = vpop.permute.xlu0 %469  ;;  %v484_v45 = vmul.f32 %v483_v36, %v477_v43  ;;  %v500_v48 = vmul.f32 %v499_v40, %v477_v43  ;;  %v524_v60 = vmul.f32 %v523_v49, %v477_v43  ;;  %v548_v5 = vmul.f32 %v547_v57, %v477_v43 }
 0x1ce   :  { %v478_v47 = vsel %vm461_vm3, %v470_v44, %v475_v39  ;;  %v572_v15 = vmul.f32 %v571_v6, %v477_v43 }
 0x1cf   :  { %488 = vrot.lane.b32.xlu0 %v484_v45, %s1008_s21  ;;  %v468_v50 = vpop.permute.xlu1 %467  ;;  %v502_v51 = vmul.f32 %v499_v40, %v478_v47  ;;  %v526_v56 = vmul.f32 %v523_v49, %v478_v47  ;;  %v507_v58 = vrot.slane %v500_v48, 1  ;;  %v550_v3 = vmul.f32 %v547_v57, %v478_v47 }
 0x1d0   :  { %v485_v52 = vmul.f32 %v483_v36, %v468_v50  ;;  %v501_v53 = vmul.f32 %v499_v40, %v468_v50  ;;  %v525_v54 = vmul.f32 %v523_v49, %v468_v50  ;;  %v549_v1 = vmul.f32 %v547_v57, %v468_v50 }
 0x1d1   :  { %v510_v55 = vrot.slane %v502_v51, 1  ;;  %v534_v2 = vrot.slane %v526_v56, 2  ;;  %v531_v4 = vrot.slane %v524_v60, 2  ;;  %v573_v9 = vmul.f32 %v571_v6, %v468_v50 }
 0x1d2   :  { %490 = vrot.lane.b32.xlu1 %v485_v52, %s1008_s21  ;;  %v508_v59 = vrot.slane %v501_v53, 1  ;;  %v532_v0 = vrot.slane %v525_v54, 2  ;;  %v556_v8 = vrot.slane %v549_v1, 3  ;;  %v558_v11 = vrot.slane %v550_v3, 3 }
 0x1d3   :  { %v574_v12 = vmul.f32 %v571_v6, %v478_v47  ;;  %v555_v13 = vrot.slane %v548_v5, 3  ;;  %v580_v19 = vrot.slane %v573_v9, 4  ;;  %v579_v23 = vrot.slane %v572_v15, 4 }
 0x1d4   :  { %v509_v62 = vsel %vm506_vm5, %v507_v58, %v508_v59  ;;  %v511_v63 = vsel %vm506_vm5, %v508_v59, %v510_v55  ;;  %v533_v7 = vsel %vm530_vm6, %v531_v4, %v532_v0  ;;  %v535_v10 = vsel %vm530_vm6, %v532_v0, %v534_v2 }
 0x1d5   :  { %512 = vrot.lane.b32.xlu0 %v509_v62, %s1008_s21  ;;  %v557_v16 = vsel %vm554_vm7, %v555_v13, %v556_v8  ;;  %v559_v20 = vsel %vm554_vm7, %v556_v8, %v558_v11  ;;  %v582_v22 = vrot.slane %v574_v12, 4  ;;  %v581_v24 = vsel %vm578_vm8, %v579_v23, %v580_v19 }
 0x1d6   :  { %514 = vrot.lane.b32.xlu1 %v511_v63, %s1008_s21 }
 0x1d7   :  { %v583_v25 = vsel %vm578_vm8, %v580_v19, %v582_v22 }
 0x1d9   :  { %536 = vrot.lane.b32.xlu0 %v533_v7, %s1008_s21 }
 0x1da   :  { %538 = vrot.lane.b32.xlu1 %v535_v10, %s1008_s21 }
 0x1dd   :  { %560 = vrot.lane.b32.xlu0 %v557_v16, %s1008_s21 }
 0x1de   :  { %562 = vrot.lane.b32.xlu1 %v559_v20, %s1008_s21 }
 0x1e1   :  { %584 = vrot.lane.b32.xlu0 %v581_v24, %s1008_s21 }
 0x1e2   :  { %586 = vrot.lane.b32.xlu1 %v583_v25, %s1008_s21 }
 0x1e5   :  { %231 = vrot.lane.b32.xlu0 %v1209_v17, %s1016_s5 }
 0x1e6   :  { %233 = vrot.lane.b32.xlu1 %v1216_v21, %s1016_s5 }
 0x1e9   :  { %256 = vrot.lane.b32.xlu0 %v1209_v17, %s1017_s18 }
 0x1ea   :  { %258 = vrot.lane.b32.xlu1 %v1216_v21, %s1017_s18 }
 0x1ed   :  { %283 = vrot.lane.b32.xlu0 %v1209_v17, %s1018_s19 }
 0x1ee   :  { %285 = vrot.lane.b32.xlu1 %v1216_v21, %s1018_s19 }
 0x1f1   :  { %310 = vrot.lane.b32.xlu0 %v1209_v17, %s1019_s20 }
 0x1f2   :  { %312 = vrot.lane.b32.xlu1 %v1216_v21, %s1019_s20 }
 0x1f5   :  { %239 = vrot.lane.b32.xlu0 %v1209_v17, %s1008_s21 }
 0x1f6   :  { %241 = vrot.lane.b32.xlu1 %v1216_v21, %s1008_s21 }
 0x1f9   :  { %247 = vrot.lane.b32.xlu0 %v1209_v17, %s1020_s23 }
 0x1fa   :  { %249 = vrot.lane.b32.xlu1 %v1216_v21, %s1020_s23 }
 0x1fd   :  { %265 = vrot.lane.b32.xlu0 %v1209_v17, %s1021_s24 }
 0x1fe   :  { %267 = vrot.lane.b32.xlu1 %v1216_v21, %s1021_s24 }
 0x201   :  { %274 = vrot.lane.b32.xlu0 %v1209_v17, %s1022_s25 }
 0x202   :  { %276 = vrot.lane.b32.xlu1 %v1216_v21, %s1022_s25 }
 0x205   :  { %292 = vrot.lane.b32.xlu0 %v1209_v17, %s1023_s26 }
 0x206   :  { %294 = vrot.lane.b32.xlu1 %v1216_v21, %s1023_s26 }
 0x209   :  { %301 = vrot.lane.b32.xlu0 %v1209_v17, %s1024_s3 }
 0x20a   :  { %303 = vrot.lane.b32.xlu1 %v1216_v21, %s1024_s3 }
 0x20d   :  { %319 = vrot.lane.b32.xlu0 %v1209_v17, %s1025_s12 }
 0x20e   :  { %321 = vrot.lane.b32.xlu1 %v1216_v21, %s1025_s12 }
 0x241   :  { %v489_v26 = vpop.permute.xlu0 %488 }
 0x242   :  { %v494_v35 = vadd.f32 %v489_v26, %v1205_v14 }
 0x244   :  { %v491_v27 = vpop.permute.xlu1 %490 }
 0x245   :  { %v495_v37 = vadd.f32 %v491_v27, %v1211_v18 }
 0x247   :  { %v513_v30 = vpop.permute.xlu0 %512 }
 0x248   :  { %v515_v32 = vpop.permute.xlu1 %514  ;;  %v518_v38 = vadd.f32 %v513_v30, %v494_v35 }
 0x249   :  { %v519_v39 = vadd.f32 %v515_v32, %v495_v37 }
 0x24b   :  { %v537_v34 = vpop.permute.xlu0 %536 }
 0x24c   :  { %v539_v36 = vpop.permute.xlu1 %538  ;;  %v542_v17 = vadd.f32 %v537_v34, %v518_v38 }
 0x24d   :  { %v543_v21 = vadd.f32 %v539_v36, %v519_v39 }
 0x24f   :  { %v561_v40 = vpop.permute.xlu0 %560 }
 0x250   :  { %v563_v41 = vpop.permute.xlu1 %562  ;;  %v566_v42 = vadd.f32 %v561_v40, %v542_v17 }
 0x251   :  { %v567_v43 = vadd.f32 %v563_v41, %v543_v21 }
 0x253   :  { %v585_v44 = vpop.permute.xlu0 %584 }
 0x254   :  { %v590_v45 = vadd.f32 %v585_v44, %v566_v42  ;;  %v587_v46 = vpop.permute.xlu1 %586 }
 0x255   :  { %v591_v47 = vadd.f32 %v587_v46, %v567_v43 }
 0x256   :  { %594 = vrot.lane.b32.xlu0 %v590_v45, %s1008_s21 }
 0x257   :  { %v232_v48 = vpop.permute.xlu0 %231  ;;  %596 = vrot.lane.b32.xlu1 %v591_v47, %s1008_s21 }
 0x258   :  { %237 = vst.msk [vmem:[#allocation14] sm:$0xf] %vm228_vm2, %v232_v48  ;;  %v234_v14 = vpop.permute.xlu1 %233 }
 0x259   :  { %238 = vst.msk [vmem:[#allocation14 + $0x4] sm:$0xf] %vm228_vm2, %v234_v14 }
 0x25b   :  { %v257_v18 = vpop.permute.xlu0 %256 }
 0x25c   :  { %263 = vst.msk [vmem:[#allocation14 + $0x8] sm:$0xf] %vm228_vm2, %v257_v18  ;;  %v259_v49 = vpop.permute.xlu1 %258 }
 0x25d   :  { %264 = vst.msk [vmem:[#allocation14 + $0xc] sm:$0xf] %vm228_vm2, %v259_v49 }
 0x25f   :  { %v284_v50 = vpop.permute.xlu0 %283 }
 0x260   :  { %290 = vst.msk [vmem:[#allocation14 + $0x10] sm:$0xf] %vm228_vm2, %v284_v50  ;;  %v286_v51 = vpop.permute.xlu1 %285 }
 0x261   :  { %291 = vst.msk [vmem:[#allocation14 + $0x14] sm:$0xf] %vm228_vm2, %v286_v51 }
 0x263   :  { %v311_v52 = vpop.permute.xlu0 %310 }
 0x264   :  { %317 = vst.msk [vmem:[#allocation14 + $0x18] sm:$0xf] %vm228_vm2, %v311_v52  ;;  %v313_v53 = vpop.permute.xlu1 %312 }
 0x265   :  { %318 = vst.msk [vmem:[#allocation14 + $0x1c] sm:$0xf] %vm228_vm2, %v313_v53 }
 0x266   :  { %915 = shalt.err (!%p912_p10)
}
 0x267   :  { %s916_s30 = scalar_lea.hbm %s1355_s7, 512 }
 0x268   :  { %p917_p11 = scmp.ne.s32.totalorder %s1355_s7, %s916_s30  ;;  %p920_p12 = scmp.lt.u32.totalorder %s916_s30, %s1355_s7 }
 0x26a   :  { %p922_p13 = pnand %p920_p12, %p917_p11 }
 0x26c   :  { %925 = shalt.err (!%p922_p13)
}
 0x26d   :  { %626 = dma.vmem_to_hbm [thread:$0]  %s621_s2, 512, %s1355_s7, [#allocation15], %s1008_s21, %s1008_s21, %s1009_s22   ;;  %v240_v54 = vpop.permute.xlu0 %239  ;;  %v242_v55 = vpop.permute.xlu1 %241 }
 0x26e   :  { %245 = vst.msk [vmem:[#allocation16] sm:$0xf] %vm228_vm2, %v240_v54  ;;  %246 = vst.msk [vmem:[#allocation16 + $0x4] sm:$0xf] %vm228_vm2, %v242_v55  ;;  %s1027_s7 = smov [#allocation13]   ;;  %s1028_s4 = smov [#allocation16]  }
 0x26f   :  { %s608_s15 = sshll.u32 %s1027_s7, 4  ;;  %s632_s16 = sshll.u32 %s1028_s4, 4  ;;  %s609_s15 = int_to_ptr.vmem [resolvable:$true] %s608_s15  ;;  %s633_s16 = int_to_ptr.vmem [resolvable:$true] %s632_s16 }
 0x270   :  { %s926_s5 = scalar_lea.vmem %s609_s15, 512  ;;  %p931_p1 = scmp.lt.s32.totalorder %s609_s15, %s609_s15 }
 0x271   :  { %v248_v56 = vpop.permute.xlu0 %247  ;;  %v250_v57 = vpop.permute.xlu1 %249  ;;  %p927_p0 = scmp.ne.s32.totalorder %s609_s15, %s926_s5  ;;  %p932_p2 = scmp.lt.s32.totalorder %s926_s5, %s926_s5 }
 0x272   :  { %254 = vst.msk [vmem:[#allocation13 + $0x8] sm:$0xf] %vm228_vm2, %v248_v56  ;;  %255 = vst.msk [vmem:[#allocation13 + $0xc] sm:$0xf] %vm228_vm2, %v250_v57 }
 0x273   :  { %p933_p3 = por %p932_p2, %p931_p1 }
 0x275   :  { %v266_v58 = vpop.permute.xlu0 %265  ;;  %v268_v59 = vpop.permute.xlu1 %267  ;;  %p934_p4 = pnand %p933_p3, %p927_p0 }
 0x276   :  { %272 = vst.msk [vmem:[#allocation16 + $0x8] sm:$0xf] %vm228_vm2, %v266_v58  ;;  %273 = vst.msk [vmem:[#allocation16 + $0xc] sm:$0xf] %vm228_vm2, %v268_v59 }
 0x279   :  { %v275_v60 = vpop.permute.xlu0 %274  ;;  %v277_v61 = vpop.permute.xlu1 %276 }
 0x27a   :  { %281 = vst.msk [vmem:[#allocation13 + $0x10] sm:$0xf] %vm228_vm2, %v275_v60  ;;  %282 = vst.msk [vmem:[#allocation13 + $0x14] sm:$0xf] %vm228_vm2, %v277_v61 }
 0x27d   :  { %v293_v62 = vpop.permute.xlu0 %292  ;;  %v295_v63 = vpop.permute.xlu1 %294 }
 0x27e   :  { %299 = vst.msk [vmem:[#allocation16 + $0x10] sm:$0xf] %vm228_vm2, %v293_v62  ;;  %300 = vst.msk [vmem:[#allocation16 + $0x14] sm:$0xf] %vm228_vm2, %v295_v63 }
 0x281   :  { %v302_v0 = vpop.permute.xlu0 %301  ;;  %v304_v1 = vpop.permute.xlu1 %303 }
 0x282   :  { %308 = vst.msk [vmem:[#allocation13 + $0x18] sm:$0xf] %vm228_vm2, %v302_v0  ;;  %309 = vst.msk [vmem:[#allocation13 + $0x1c] sm:$0xf] %vm228_vm2, %v304_v1 }
 0x283   :  { %937 = shalt.err (!%p934_p4)
}
 0x284   :  { %s938_s20 = scalar_lea.hbm %s1354_s6, 512 }
 0x285   :  { %p939_p5 = scmp.ne.s32.totalorder %s1354_s6, %s938_s20  ;;  %p942_p6 = scmp.lt.u32.totalorder %s938_s20, %s1354_s6 }
 0x287   :  { %p944_p7 = pnand %p942_p6, %p939_p5 }
 0x289   :  { %947 = shalt.err (!%p944_p7)
}
 0x28a   :  { %614 = dma.vmem_to_hbm [thread:$0]  %s609_s15, 512, %s1354_s6, [#allocation4], %s1008_s21, %s1008_s21, %s1009_s22   ;;  %v320_v2 = vpop.permute.xlu0 %319  ;;  %v322_v3 = vpop.permute.xlu1 %321 }
 0x28b   :  { %326 = vst.msk [vmem:[#allocation16 + $0x18] sm:$0xf] %vm228_vm2, %v320_v2  ;;  %327 = vst.msk [vmem:[#allocation16 + $0x1c] sm:$0xf] %vm228_vm2, %v322_v3  ;;  %s948_s27 = scalar_lea.vmem %s633_s16, 512  ;;  %p953_p9 = scmp.lt.s32.totalorder %s633_s16, %s633_s16 }
 0x28c   :  { %p949_p8 = scmp.ne.s32.totalorder %s633_s16, %s948_s27  ;;  %p954_p10 = scmp.lt.s32.totalorder %s948_s27, %s948_s27 }
 0x28e   :  { %p955_p11 = por %p954_p10, %p953_p9 }
 0x290   :  { %p956_p12 = pnand %p955_p11, %p949_p8 }
 0x292   :  { %959 = shalt.err (!%p956_p12)
}
 0x293   :  { %s960_s28 = scalar_lea.hbm %s1356_s8, 512 }
 0x294   :  { %p961_p13 = scmp.ne.s32.totalorder %s1356_s8, %s960_s28  ;;  %p964_p0 = scmp.lt.u32.totalorder %s960_s28, %s1356_s8 }
 0x296   :  { %p966_p1 = pnand %p964_p0, %p961_p13 }
 0x298   :  { %969 = shalt.err (!%p966_p1)
}
 0x299   :  { %638 = dma.vmem_to_hbm [thread:$0]  %s633_s16, 512, %s1356_s8, [#allocation15], %s1008_s21, %s1008_s21, %s1009_s22   ;;  %vm600_vm9 = vcmask 261120  }
 0x29a   :  { %s1029_s10 = smov [#allocation17]  }
 0x29b   :  { %s644_s14 = sshll.u32 %s1029_s10, 4  ;;  %s645_s14 = int_to_ptr.vmem [resolvable:$true] %s644_s14 }
 0x29c   :  { %s970_s0 = scalar_lea.vmem %s645_s14, 256  ;;  %p975_p3 = scmp.lt.s32.totalorder %s645_s14, %s645_s14 }
 0x29d   :  { %p971_p2 = scmp.ne.s32.totalorder %s645_s14, %s970_s0  ;;  %p976_p4 = scmp.lt.s32.totalorder %s970_s0, %s970_s0 }
 0x29f   :  { %p977_p5 = por %p976_p4, %p975_p3 }
 0x2a1   :  { %p978_p6 = pnand %p977_p5, %p971_p2 }
 0x2c8   :  { %v595_v4 = vpop.permute.xlu0 %594 }
 0x2c9   :  { %601 = vst.msk [vmem:[#allocation17] sm:$0xff] %vm600_vm9, %v595_v4  ;;  %v597_v5 = vpop.permute.xlu1 %596 }
 0x2ca   :  { %602 = vst.msk [vmem:[#allocation17 + $0x8] sm:$0xff] %vm600_vm9, %v597_v5 }
 0x2cb   :  { %981 = shalt.err (!%p978_p6)
}
 0x2cc   :  { %s982_s4 = scalar_lea.hbm %s1357_s9, 256 }
 0x2cd   :  { %p983_p7 = scmp.ne.s32.totalorder %s1357_s9, %s982_s4  ;;  %p986_p8 = scmp.lt.u32.totalorder %s982_s4, %s1357_s9 }
 0x2cf   :  { %p988_p9 = pnand %p986_p8, %p983_p7 }
 0x2d1   :  { %991 = shalt.err (!%p988_p9)
}
 0x2d2   :  { %s1030_s5 = smov 128   ;;  %s1031_s18 = smov 8  }
 0x2d3   :  { %650 = dma.vmem_to_hbm [thread:$0]  %s645_s14, 256, %s1357_s9, [#allocation18], %s1030_s5, %s1030_s5, %s1031_s18  }
 0x2d4   :  { %1000 = dma.done.wait [#allocation4], 512  }
 0x2d5   :  { %1001 = vsyncadd [#allocation4], 4294966784 }
 0x2d6   :  { %1002 = dma.done.wait [#allocation15], 1024  }
 0x2d7   :  { %1003 = vsyncadd [#allocation15], 4294966272 }
 0x2d8   :  { %1004 = dma.done.wait [#allocation18], 256  }
 0x2d9   :  { %1005 = vsyncadd [#allocation18], 4294967040 }
 0x2da   :  { %663 = vsyncpa [#allocation3], 1 }
 0x2db   :  { %664 = vsyncpa [#allocation6], 1 }
 0x2dc   :  { %665 = vsyncpa [#allocation9], 1 }
 0x2dd   :  { %666 = vsyncpa [#allocation12], 1 }
 0x2de   :  { %667 = vsyncpa [#allocation4], 1 }
 0x2df   :  { %668 = vsyncpa [#allocation15], 1 }
 0x2e0   :  { %669 = vsyncpa [#allocation18], 1 }

</bundles_post_ra>
